<compile_context>
chip_gen: v6e
topology: v6e:2x2x1
jax: 0.10.0
libtpu: 0.0.40
codegen_flags: <defaults>
</compile_context>

<pallas_src>
import functools
import math

import jax
import jax.numpy as jnp
from jax.experimental import pallas as pl
from jax.experimental.pallas import tpu as pltpu

D_MODEL = 32
NHEAD = 4
SEQ = 8
BATCH = 2
EPS = 1e-5


def _layernorm(x, gamma, beta):
    mean = jnp.mean(x, axis=-1, keepdims=True)
    var = jnp.mean(jnp.square(x - mean), axis=-1, keepdims=True)
    return (x - mean) * jax.lax.rsqrt(var + EPS) * gamma + beta


def tattention_kernel(x_ref, vec_ref, wqkv_ref, wffn_ref, o_ref, *,
                      batch, seq, nhead):
    # Whole problem handled in a single invocation; all refs are full arrays
    # resident in VMEM.  Rows = B*S (batch folded into the sublane/M dim).
    x2 = x_ref[...]                                      # (B*S, D)
    D = x2.shape[-1]

    vecs = vec_ref[...]                                  # (6, D)
    g1, b1 = vecs[0:1, :], vecs[1:2, :]
    g2, b2 = vecs[2:3, :], vecs[3:4, :]
    bf1, bf2 = vecs[4:5, :], vecs[5:6, :]

    # norm1 (rowwise over the folded B*S rows).
    xn2 = _layernorm(x2, g1, b1)                         # (B*S, D)

    # Fused Q/K/V projection: one MXU push against the host-packed
    # (D, 3D) slab [wq.T | wk.T | wv.T].  No in-kernel transposes.
    qkv = jnp.dot(xn2, wqkv_ref[...],
                  preferred_element_type=jnp.float32)    # (B*S, 3D)

    q = qkv[:, 0 * D:1 * D].reshape(batch, seq, D)
    k = qkv[:, 1 * D:2 * D].reshape(batch, seq, D)
    v = qkv[:, 2 * D:3 * D].reshape(batch, seq, D)

    # Per-head attention with static lane slices (exactly the PyTorch loop,
    # incl. the "last head takes the remainder" rule).  NOTE: TAttention has
    # no 1/sqrt(head_dim) scaling -- reproduce exactly.
    dim = D // nhead
    outs = []
    for h in range(nhead):
        lo = h * dim
        hi = D if h == nhead - 1 else (h + 1) * dim
        qh, kh, vh = q[..., lo:hi], k[..., lo:hi], v[..., lo:hi]
        s = jnp.einsum('bqd,bkd->bqk', qh, kh,
                       preferred_element_type=jnp.float32)        # (B, S, S)
        s = s - jnp.max(s, axis=-1, keepdims=True)
        p = jnp.exp(s)
        p = p / jnp.sum(p, axis=-1, keepdims=True)                # exact softmax
        outs.append(jnp.einsum('bqk,bkd->bqd', p, vh,
                               preferred_element_type=jnp.float32))
    att2 = jnp.concatenate(outs, axis=-1).reshape(batch * seq, D)  # (B*S, D)

    # residual + norm2
    xt2 = _layernorm(xn2 + att2, g2, b2)

    # ffn: Linear -> ReLU -> (Dropout) -> Linear -> (Dropout); weights were
    # stored (in, out) on the host, so no in-kernel transpose.
    h1 = jnp.maximum(
        jnp.dot(xt2, wffn_ref[0], preferred_element_type=jnp.float32) + bf1,
        0.0)
    y2 = jnp.dot(h1, wffn_ref[1], preferred_element_type=jnp.float32) + bf2

    o_ref[...] = (xt2 + y2).astype(o_ref.dtype)


def pack_params(params):
    """One-time host-side packing: transpose + fuse weights, stack vectors."""
    (g1, b1, wq, wk, wv, g2, b2, w1, bf1, w2, bf2) = params
    # PyTorch Linear: y = x @ W.T  ->  store W.T; fuse Q/K/V along lanes.
    wqkv = jnp.concatenate([wq.T, wk.T, wv.T], axis=-1)          # (D, 3D)
    wffn = jnp.stack([w1.T, w2.T], axis=0)                       # (2, D, D)
    vecs = jnp.concatenate([g1, b1, g2, b2, bf1, bf2], axis=0)   # (6, D)
    return vecs, wqkv, wffn


def tattention_pallas(x, packed_params, nhead=NHEAD):
    B, S, D = x.shape
    vecs, wqkv, wffn = packed_params
    x2 = x.reshape(B * S, D)       # fold batch into the row dim (wrapper side)

    vmem = pl.BlockSpec(memory_space=pltpu.MemorySpace.VMEM)
    kernel = functools.partial(tattention_kernel, batch=B, seq=S, nhead=nhead)
    # No grid: single step, whole working set (~40 KB) resident in VMEM on all
    # generations; no per-step pipeline overhead, no double-buffering needed.
    out2 = pl.pallas_call(
        kernel,
        out_shape=jax.ShapeDtypeStruct((B * S, D), jnp.float32),
        in_specs=[vmem, vmem, vmem, vmem],
        out_specs=vmem,
    )(x2, vecs, wqkv, wffn)
    return out2.reshape(B, S, D)


def tattention_ref(x, params, nhead=NHEAD):
    """Pure-JAX reference mirroring the PyTorch forward (f32-exact matmuls)."""
    (g1, b1, wq, wk, wv, g2, b2, w1, bf1, w2, bf2) = params
    hp = jax.lax.Precision.HIGHEST   # match the kernel's f32 MXU matmuls
    xn = _layernorm(x, g1[0], b1[0])
    q = jnp.dot(xn, wq.T, precision=hp)
    k = jnp.dot(xn, wk.T, precision=hp)
    v = jnp.dot(xn, wv.T, precision=hp)
    d = x.shape[-1]
    dim = d // nhead
    outs = []
    for i in range(nhead):
        lo = i * dim
        hi = d if i == nhead - 1 else (i + 1) * dim
        qh, kh, vh = q[..., lo:hi], k[..., lo:hi], v[..., lo:hi]
        a = jax.nn.softmax(jnp.einsum('bqd,bkd->bqk', qh, kh, precision=hp),
                           axis=-1)
        outs.append(jnp.einsum('bqk,bkd->bqd', a, vh, precision=hp))
    att = jnp.concatenate(outs, axis=-1)
    xt = _layernorm(xn + att, g2[0], b2[0])
    h = jnp.maximum(jnp.dot(xt, w1.T, precision=hp) + bf1[0], 0.0)
    return xt + jnp.dot(h, w2.T, precision=hp) + bf2[0]


def init_params(key, d_model):
    """Deterministic parameter init (PyTorch-style shapes / conventions)."""
    ks = jax.random.split(key, 7)
    bound = 1.0 / math.sqrt(d_model)

    def lin_w(k):
        return jax.random.uniform(k, (d_model, d_model), jnp.float32,
                                  -bound, bound)

    g1 = jnp.ones((1, d_model), jnp.float32)
    b1 = jnp.zeros((1, d_model), jnp.float32)
    g2 = jnp.ones((1, d_model), jnp.float32)
    b2 = jnp.zeros((1, d_model), jnp.float32)
    wq, wk, wv, w1, w2 = (lin_w(k) for k in ks[:5])
    bf1 = jax.random.uniform(ks[5], (1, d_model), jnp.float32, -bound, bound)
    bf2 = jax.random.uniform(ks[6], (1, d_model), jnp.float32, -bound, bound)
    return (g1, b1, wq, wk, wv, g2, b2, w1, bf1, w2, bf2)


if __name__ == "__main__":
    key = jax.random.PRNGKey(0)
    kx, kp = jax.random.split(key)
    x = jax.random.normal(kx, (BATCH, SEQ, D_MODEL), jnp.float32)
    params = init_params(kp, D_MODEL)
    packed = pack_params(params)   # one-time host-side weight prep

    out = tattention_pallas(x, packed, nhead=NHEAD)
    out = jax.block_until_ready(out)

    ref = tattention_ref(x, params, nhead=NHEAD)
    assert out.shape == (BATCH, SEQ, D_MODEL)
    max_err = jnp.max(jnp.abs(out - ref))
    # Exact softmax division + f32 matmuls on both sides -> tight tolerance.
    assert jnp.allclose(out, ref, atol=1e-4, rtol=1e-4), f"max abs err {max_err}"
    print("KERNEL_OK")
</pallas_src>

<mosaic_0001>
module attributes {stable_mosaic.version = 11 : i64} {
  func.func @tattention_kernel(%arg0: memref<16x32xf32, #tpu.memory_space<vmem>>, %arg1: memref<6x32xf32, #tpu.memory_space<vmem>>, %arg2: memref<32x96xf32, #tpu.memory_space<vmem>>, %arg3: memref<2x32x32xf32, #tpu.memory_space<vmem>>, %arg4: memref<16x32xf32, #tpu.memory_space<vmem>>) attributes {dimension_semantics = [], scalar_prefetch = 0 : i64, scratch_operands = 0 : i64, tpu.core_type = #tpu.core_type<tc>} {
    %c0 = arith.constant 0 : index
    %c0_0 = arith.constant 0 : index
    %0 = vector.load %arg0[%c0, %c0_0] : memref<16x32xf32, #tpu.memory_space<vmem>>, vector<16x32xf32>
    %c0_1 = arith.constant 0 : index
    %c0_2 = arith.constant 0 : index
    %1 = vector.load %arg1[%c0_1, %c0_2] : memref<6x32xf32, #tpu.memory_space<vmem>>, vector<6x32xf32>
    %2 = vector.extract_strided_slice %1 {offsets = [0, 0], sizes = [1, 32], strides = [1, 1]} : vector<6x32xf32> to vector<1x32xf32>
    %3 = vector.extract_strided_slice %1 {offsets = [1, 0], sizes = [1, 32], strides = [1, 1]} : vector<6x32xf32> to vector<1x32xf32>
    %4 = vector.extract_strided_slice %1 {offsets = [2, 0], sizes = [1, 32], strides = [1, 1]} : vector<6x32xf32> to vector<1x32xf32>
    %5 = vector.extract_strided_slice %1 {offsets = [3, 0], sizes = [1, 32], strides = [1, 1]} : vector<6x32xf32> to vector<1x32xf32>
    %6 = vector.extract_strided_slice %1 {offsets = [4, 0], sizes = [1, 32], strides = [1, 1]} : vector<6x32xf32> to vector<1x32xf32>
    %7 = vector.extract_strided_slice %1 {offsets = [5, 0], sizes = [1, 32], strides = [1, 1]} : vector<6x32xf32> to vector<1x32xf32>
    %cst = arith.constant dense<0.000000e+00> : vector<16xf32>
    %8 = vector.multi_reduction <add>, %0, %cst [1] : vector<16x32xf32> to vector<16xf32>
    %9 = vector.shape_cast %8 : vector<16xf32> to vector<16x1xf32>
    %cst_3 = arith.constant 3.200000e+01 : f32
    %10 = vector.broadcast %cst_3 : f32 to vector<16x1xf32>
    %11 = arith.divf %9, %10 : vector<16x1xf32>
    %12 = vector.broadcast %11 : vector<16x1xf32> to vector<16x32xf32>
    %13 = arith.subf %0, %12 : vector<16x32xf32>
    %14 = arith.mulf %13, %13 : vector<16x32xf32>
    %cst_4 = arith.constant dense<0.000000e+00> : vector<16xf32>
    %15 = vector.multi_reduction <add>, %14, %cst_4 [1] : vector<16x32xf32> to vector<16xf32>
    %16 = vector.shape_cast %15 : vector<16xf32> to vector<16x1xf32>
    %cst_5 = arith.constant 3.200000e+01 : f32
    %17 = vector.broadcast %cst_5 : f32 to vector<16x1xf32>
    %18 = arith.divf %16, %17 : vector<16x1xf32>
    %19 = vector.broadcast %11 : vector<16x1xf32> to vector<16x32xf32>
    %20 = arith.subf %0, %19 : vector<16x32xf32>
    %cst_6 = arith.constant 9.99999974E-6 : f32
    %21 = vector.broadcast %cst_6 : f32 to vector<16x1xf32>
    %22 = arith.addf %18, %21 : vector<16x1xf32>
    %23 = math.rsqrt %22 : vector<16x1xf32>
    %24 = vector.broadcast %23 : vector<16x1xf32> to vector<16x32xf32>
    %25 = arith.mulf %20, %24 : vector<16x32xf32>
    %26 = vector.broadcast %2 : vector<1x32xf32> to vector<16x32xf32>
    %27 = arith.mulf %25, %26 : vector<16x32xf32>
    %28 = vector.broadcast %3 : vector<1x32xf32> to vector<16x32xf32>
    %29 = arith.addf %27, %28 : vector<16x32xf32>
    %c0_7 = arith.constant 0 : index
    %c0_8 = arith.constant 0 : index
    %30 = vector.load %arg2[%c0_7, %c0_8] : memref<32x96xf32, #tpu.memory_space<vmem>>, vector<32x96xf32>
    %cst_9 = arith.constant dense<0.000000e+00> : vector<16x96xf32>
    %31 = tpu.matmul %29, %30, %cst_9 {dimension_numbers = #tpu.dot_dimension_numbers<[1], [0], [0], [1], [0, 0, 1, 1], [], []>} : vector<16x32xf32>, vector<32x96xf32>, vector<16x96xf32> -> vector<16x96xf32>
    %32 = vector.extract_strided_slice %31 {offsets = [0, 0], sizes = [16, 32], strides = [1, 1]} : vector<16x96xf32> to vector<16x32xf32>
    %33 = vector.shape_cast %32 : vector<16x32xf32> to vector<2x8x32xf32>
    %34 = vector.extract_strided_slice %31 {offsets = [0, 32], sizes = [16, 32], strides = [1, 1]} : vector<16x96xf32> to vector<16x32xf32>
    %35 = vector.shape_cast %34 : vector<16x32xf32> to vector<2x8x32xf32>
    %36 = vector.extract_strided_slice %31 {offsets = [0, 64], sizes = [16, 32], strides = [1, 1]} : vector<16x96xf32> to vector<16x32xf32>
    %37 = vector.shape_cast %36 : vector<16x32xf32> to vector<2x8x32xf32>
    %38 = vector.extract_strided_slice %33 {offsets = [0, 0, 0], sizes = [2, 8, 8], strides = [1, 1, 1]} : vector<2x8x32xf32> to vector<2x8x8xf32>
    %39 = vector.extract_strided_slice %35 {offsets = [0, 0, 0], sizes = [2, 8, 8], strides = [1, 1, 1]} : vector<2x8x32xf32> to vector<2x8x8xf32>
    %40 = vector.extract_strided_slice %37 {offsets = [0, 0, 0], sizes = [2, 8, 8], strides = [1, 1, 1]} : vector<2x8x32xf32> to vector<2x8x8xf32>
    "tpu.trace_start"() <{level = 10 : i32, message = "bqd,bkd->bqk"}> : () -> ()
    %cst_10 = arith.constant dense<0.000000e+00> : vector<2x8x8xf32>
    %41 = tpu.matmul %38, %39, %cst_10 {dimension_numbers = #tpu.dot_dimension_numbers<[2], [2], [1], [1], [0, 0, 0, 1, 1, 1], [0], [0]>} : vector<2x8x8xf32>, vector<2x8x8xf32>, vector<2x8x8xf32> -> vector<2x8x8xf32>
    "tpu.trace_stop"() : () -> ()
    %cst_11 = arith.constant dense<0xFF800000> : vector<2x8xf32>
    %42 = vector.multi_reduction <maximumf>, %41, %cst_11 [2] : vector<2x8x8xf32> to vector<2x8xf32>
    %43 = vector.shape_cast %42 : vector<2x8xf32> to vector<2x8x1xf32>
    %44 = vector.broadcast %43 : vector<2x8x1xf32> to vector<2x8x8xf32>
    %45 = arith.subf %41, %44 : vector<2x8x8xf32>
    %46 = math.exp %45 : vector<2x8x8xf32>
    %cst_12 = arith.constant dense<0.000000e+00> : vector<2x8xf32>
    %47 = vector.multi_reduction <add>, %46, %cst_12 [2] : vector<2x8x8xf32> to vector<2x8xf32>
    %48 = vector.shape_cast %47 : vector<2x8xf32> to vector<2x8x1xf32>
    %49 = vector.broadcast %48 : vector<2x8x1xf32> to vector<2x8x8xf32>
    %50 = arith.divf %46, %49 : vector<2x8x8xf32>
    "tpu.trace_start"() <{level = 10 : i32, message = "bqk,bkd->bqd"}> : () -> ()
    %cst_13 = arith.constant dense<0.000000e+00> : vector<2x8x8xf32>
    %51 = tpu.matmul %50, %40, %cst_13 {dimension_numbers = #tpu.dot_dimension_numbers<[2], [1], [1], [2], [0, 0, 0, 1, 1, 2], [0], [0]>} : vector<2x8x8xf32>, vector<2x8x8xf32>, vector<2x8x8xf32> -> vector<2x8x8xf32>
    "tpu.trace_stop"() : () -> ()
    %52 = vector.extract_strided_slice %33 {offsets = [0, 0, 8], sizes = [2, 8, 8], strides = [1, 1, 1]} : vector<2x8x32xf32> to vector<2x8x8xf32>
    %53 = vector.extract_strided_slice %35 {offsets = [0, 0, 8], sizes = [2, 8, 8], strides = [1, 1, 1]} : vector<2x8x32xf32> to vector<2x8x8xf32>
    %54 = vector.extract_strided_slice %37 {offsets = [0, 0, 8], sizes = [2, 8, 8], strides = [1, 1, 1]} : vector<2x8x32xf32> to vector<2x8x8xf32>
    "tpu.trace_start"() <{level = 10 : i32, message = "bqd,bkd->bqk"}> : () -> ()
    %cst_14 = arith.constant dense<0.000000e+00> : vector<2x8x8xf32>
    %55 = tpu.matmul %52, %53, %cst_14 {dimension_numbers = #tpu.dot_dimension_numbers<[2], [2], [1], [1], [0, 0, 0, 1, 1, 1], [0], [0]>} : vector<2x8x8xf32>, vector<2x8x8xf32>, vector<2x8x8xf32> -> vector<2x8x8xf32>
    "tpu.trace_stop"() : () -> ()
    %cst_15 = arith.constant dense<0xFF800000> : vector<2x8xf32>
    %56 = vector.multi_reduction <maximumf>, %55, %cst_15 [2] : vector<2x8x8xf32> to vector<2x8xf32>
    %57 = vector.shape_cast %56 : vector<2x8xf32> to vector<2x8x1xf32>
    %58 = vector.broadcast %57 : vector<2x8x1xf32> to vector<2x8x8xf32>
    %59 = arith.subf %55, %58 : vector<2x8x8xf32>
    %60 = math.exp %59 : vector<2x8x8xf32>
    %cst_16 = arith.constant dense<0.000000e+00> : vector<2x8xf32>
    %61 = vector.multi_reduction <add>, %60, %cst_16 [2] : vector<2x8x8xf32> to vector<2x8xf32>
    %62 = vector.shape_cast %61 : vector<2x8xf32> to vector<2x8x1xf32>
    %63 = vector.broadcast %62 : vector<2x8x1xf32> to vector<2x8x8xf32>
    %64 = arith.divf %60, %63 : vector<2x8x8xf32>
    "tpu.trace_start"() <{level = 10 : i32, message = "bqk,bkd->bqd"}> : () -> ()
    %cst_17 = arith.constant dense<0.000000e+00> : vector<2x8x8xf32>
    %65 = tpu.matmul %64, %54, %cst_17 {dimension_numbers = #tpu.dot_dimension_numbers<[2], [1], [1], [2], [0, 0, 0, 1, 1, 2], [0], [0]>} : vector<2x8x8xf32>, vector<2x8x8xf32>, vector<2x8x8xf32> -> vector<2x8x8xf32>
    "tpu.trace_stop"() : () -> ()
    %66 = vector.extract_strided_slice %33 {offsets = [0, 0, 16], sizes = [2, 8, 8], strides = [1, 1, 1]} : vector<2x8x32xf32> to vector<2x8x8xf32>
    %67 = vector.extract_strided_slice %35 {offsets = [0, 0, 16], sizes = [2, 8, 8], strides = [1, 1, 1]} : vector<2x8x32xf32> to vector<2x8x8xf32>
    %68 = vector.extract_strided_slice %37 {offsets = [0, 0, 16], sizes = [2, 8, 8], strides = [1, 1, 1]} : vector<2x8x32xf32> to vector<2x8x8xf32>
    "tpu.trace_start"() <{level = 10 : i32, message = "bqd,bkd->bqk"}> : () -> ()
    %cst_18 = arith.constant dense<0.000000e+00> : vector<2x8x8xf32>
    %69 = tpu.matmul %66, %67, %cst_18 {dimension_numbers = #tpu.dot_dimension_numbers<[2], [2], [1], [1], [0, 0, 0, 1, 1, 1], [0], [0]>} : vector<2x8x8xf32>, vector<2x8x8xf32>, vector<2x8x8xf32> -> vector<2x8x8xf32>
    "tpu.trace_stop"() : () -> ()
    %cst_19 = arith.constant dense<0xFF800000> : vector<2x8xf32>
    %70 = vector.multi_reduction <maximumf>, %69, %cst_19 [2] : vector<2x8x8xf32> to vector<2x8xf32>
    %71 = vector.shape_cast %70 : vector<2x8xf32> to vector<2x8x1xf32>
    %72 = vector.broadcast %71 : vector<2x8x1xf32> to vector<2x8x8xf32>
    %73 = arith.subf %69, %72 : vector<2x8x8xf32>
    %74 = math.exp %73 : vector<2x8x8xf32>
    %cst_20 = arith.constant dense<0.000000e+00> : vector<2x8xf32>
    %75 = vector.multi_reduction <add>, %74, %cst_20 [2] : vector<2x8x8xf32> to vector<2x8xf32>
    %76 = vector.shape_cast %75 : vector<2x8xf32> to vector<2x8x1xf32>
    %77 = vector.broadcast %76 : vector<2x8x1xf32> to vector<2x8x8xf32>
    %78 = arith.divf %74, %77 : vector<2x8x8xf32>
    "tpu.trace_start"() <{level = 10 : i32, message = "bqk,bkd->bqd"}> : () -> ()
    %cst_21 = arith.constant dense<0.000000e+00> : vector<2x8x8xf32>
    %79 = tpu.matmul %78, %68, %cst_21 {dimension_numbers = #tpu.dot_dimension_numbers<[2], [1], [1], [2], [0, 0, 0, 1, 1, 2], [0], [0]>} : vector<2x8x8xf32>, vector<2x8x8xf32>, vector<2x8x8xf32> -> vector<2x8x8xf32>
    "tpu.trace_stop"() : () -> ()
    %80 = vector.extract_strided_slice %33 {offsets = [0, 0, 24], sizes = [2, 8, 8], strides = [1, 1, 1]} : vector<2x8x32xf32> to vector<2x8x8xf32>
    %81 = vector.extract_strided_slice %35 {offsets = [0, 0, 24], sizes = [2, 8, 8], strides = [1, 1, 1]} : vector<2x8x32xf32> to vector<2x8x8xf32>
    %82 = vector.extract_strided_slice %37 {offsets = [0, 0, 24], sizes = [2, 8, 8], strides = [1, 1, 1]} : vector<2x8x32xf32> to vector<2x8x8xf32>
    "tpu.trace_start"() <{level = 10 : i32, message = "bqd,bkd->bqk"}> : () -> ()
    %cst_22 = arith.constant dense<0.000000e+00> : vector<2x8x8xf32>
    %83 = tpu.matmul %80, %81, %cst_22 {dimension_numbers = #tpu.dot_dimension_numbers<[2], [2], [1], [1], [0, 0, 0, 1, 1, 1], [0], [0]>} : vector<2x8x8xf32>, vector<2x8x8xf32>, vector<2x8x8xf32> -> vector<2x8x8xf32>
    "tpu.trace_stop"() : () -> ()
    %cst_23 = arith.constant dense<0xFF800000> : vector<2x8xf32>
    %84 = vector.multi_reduction <maximumf>, %83, %cst_23 [2] : vector<2x8x8xf32> to vector<2x8xf32>
    %85 = vector.shape_cast %84 : vector<2x8xf32> to vector<2x8x1xf32>
    %86 = vector.broadcast %85 : vector<2x8x1xf32> to vector<2x8x8xf32>
    %87 = arith.subf %83, %86 : vector<2x8x8xf32>
    %88 = math.exp %87 : vector<2x8x8xf32>
    %cst_24 = arith.constant dense<0.000000e+00> : vector<2x8xf32>
    %89 = vector.multi_reduction <add>, %88, %cst_24 [2] : vector<2x8x8xf32> to vector<2x8xf32>
    %90 = vector.shape_cast %89 : vector<2x8xf32> to vector<2x8x1xf32>
    %91 = vector.broadcast %90 : vector<2x8x1xf32> to vector<2x8x8xf32>
    %92 = arith.divf %88, %91 : vector<2x8x8xf32>
    "tpu.trace_start"() <{level = 10 : i32, message = "bqk,bkd->bqd"}> : () -> ()
    %cst_25 = arith.constant dense<0.000000e+00> : vector<2x8x8xf32>
    %93 = tpu.matmul %92, %82, %cst_25 {dimension_numbers = #tpu.dot_dimension_numbers<[2], [1], [1], [2], [0, 0, 0, 1, 1, 2], [0], [0]>} : vector<2x8x8xf32>, vector<2x8x8xf32>, vector<2x8x8xf32> -> vector<2x8x8xf32>
    "tpu.trace_stop"() : () -> ()
    %94 = tpu.concatenate %51, %65, %79, %93 in 2 : vector<2x8x8xf32>, vector<2x8x8xf32>, vector<2x8x8xf32>, vector<2x8x8xf32> -> vector<2x8x32xf32>
    %95 = vector.shape_cast %94 : vector<2x8x32xf32> to vector<16x32xf32>
    %96 = arith.addf %29, %95 : vector<16x32xf32>
    %cst_26 = arith.constant dense<0.000000e+00> : vector<16xf32>
    %97 = vector.multi_reduction <add>, %96, %cst_26 [1] : vector<16x32xf32> to vector<16xf32>
    %98 = vector.shape_cast %97 : vector<16xf32> to vector<16x1xf32>
    %cst_27 = arith.constant 3.200000e+01 : f32
    %99 = vector.broadcast %cst_27 : f32 to vector<16x1xf32>
    %100 = arith.divf %98, %99 : vector<16x1xf32>
    %101 = vector.broadcast %100 : vector<16x1xf32> to vector<16x32xf32>
    %102 = arith.subf %96, %101 : vector<16x32xf32>
    %103 = arith.mulf %102, %102 : vector<16x32xf32>
    %cst_28 = arith.constant dense<0.000000e+00> : vector<16xf32>
    %104 = vector.multi_reduction <add>, %103, %cst_28 [1] : vector<16x32xf32> to vector<16xf32>
    %105 = vector.shape_cast %104 : vector<16xf32> to vector<16x1xf32>
    %cst_29 = arith.constant 3.200000e+01 : f32
    %106 = vector.broadcast %cst_29 : f32 to vector<16x1xf32>
    %107 = arith.divf %105, %106 : vector<16x1xf32>
    %108 = vector.broadcast %100 : vector<16x1xf32> to vector<16x32xf32>
    %109 = arith.subf %96, %108 : vector<16x32xf32>
    %cst_30 = arith.constant 9.99999974E-6 : f32
    %110 = vector.broadcast %cst_30 : f32 to vector<16x1xf32>
    %111 = arith.addf %107, %110 : vector<16x1xf32>
    %112 = math.rsqrt %111 : vector<16x1xf32>
    %113 = vector.broadcast %112 : vector<16x1xf32> to vector<16x32xf32>
    %114 = arith.mulf %109, %113 : vector<16x32xf32>
    %115 = vector.broadcast %4 : vector<1x32xf32> to vector<16x32xf32>
    %116 = arith.mulf %114, %115 : vector<16x32xf32>
    %117 = vector.broadcast %5 : vector<1x32xf32> to vector<16x32xf32>
    %118 = arith.addf %116, %117 : vector<16x32xf32>
    %c0_31 = arith.constant 0 : index
    %c0_32 = arith.constant 0 : index
    %c0_33 = arith.constant 0 : index
    %119 = vector.load %arg3[%c0_31, %c0_32, %c0_33] : memref<2x32x32xf32, #tpu.memory_space<vmem>>, vector<1x32x32xf32>
    %120 = vector.shape_cast %119 : vector<1x32x32xf32> to vector<32x32xf32>
    %cst_34 = arith.constant dense<0.000000e+00> : vector<16x32xf32>
    %121 = tpu.matmul %118, %120, %cst_34 {dimension_numbers = #tpu.dot_dimension_numbers<[1], [0], [0], [1], [0, 0, 1, 1], [], []>} : vector<16x32xf32>, vector<32x32xf32>, vector<16x32xf32> -> vector<16x32xf32>
    %122 = vector.broadcast %6 : vector<1x32xf32> to vector<16x32xf32>
    %123 = arith.addf %121, %122 : vector<16x32xf32>
    %cst_35 = arith.constant 0.000000e+00 : f32
    %124 = vector.broadcast %cst_35 : f32 to vector<16x32xf32>
    %125 = arith.maximumf %123, %124 : vector<16x32xf32>
    %c1 = arith.constant 1 : index
    %c0_36 = arith.constant 0 : index
    %c0_37 = arith.constant 0 : index
    %126 = vector.load %arg3[%c1, %c0_36, %c0_37] : memref<2x32x32xf32, #tpu.memory_space<vmem>>, vector<1x32x32xf32>
    %127 = vector.shape_cast %126 : vector<1x32x32xf32> to vector<32x32xf32>
    %cst_38 = arith.constant dense<0.000000e+00> : vector<16x32xf32>
    %128 = tpu.matmul %125, %127, %cst_38 {dimension_numbers = #tpu.dot_dimension_numbers<[1], [0], [0], [1], [0, 0, 1, 1], [], []>} : vector<16x32xf32>, vector<32x32xf32>, vector<16x32xf32> -> vector<16x32xf32>
    %129 = vector.broadcast %7 : vector<1x32xf32> to vector<16x32xf32>
    %130 = arith.addf %128, %129 : vector<16x32xf32>
    %131 = arith.addf %118, %130 : vector<16x32xf32>
    %c0_39 = arith.constant 0 : index
    %c0_40 = arith.constant 0 : index
    %132 = vector.load %arg4[%c0_39, %c0_40] : memref<16x32xf32, #tpu.memory_space<vmem>>, vector<16x32xf32>
    tpu.vector_store %arg4[%c0_39, %c0_40], %131 {strides = array<i32>} : memref<16x32xf32, #tpu.memory_space<vmem>>, vector<16x32xf32>,
    return
  }
}

</mosaic_0001>

<bundles_post_ra>
// kernel: tpu_custom_call.1
= control target key start
LH: loop header
LB: loop body
LE: loop exit
PB: predicated region body
PF: predicated region fallthrough
CT: control target
= control target key end

     0   :  { %9 = vsyncpa [#allocation3], 0  ;;  %s2403_s0 = inlined_call_operand.hbm [shape: f32[16,32], index: 0, kind: input, shape index: {}]   ;;  %s2404_s1 = inlined_call_operand.hbm [shape: f32[6,32], index: 1, kind: input, shape index: {}]   ;;  %s2405_s2 = inlined_call_operand.hbm [shape: f32[32,96], index: 2, kind: input, shape index: {}]   ;;  %s2406_s3 = inlined_call_operand.hbm [shape: f32[2,32,32], index: 3, kind: input, shape index: {}]   ;;  %s2407_s4 = inlined_call_operand.hbm [shape: f32[16,32], index: 4, kind: output, shape index: {}]  }
   0x1   :  { %10 = vsyncpa [#allocation6], 0 }
   0x2   :  { %11 = vsyncpa [#allocation9], 0 }
   0x3   :  { %12 = vsyncpa [#allocation4], 0  ;;  %s2157_s15 = smov [#allocation5]   ;;  %s2158_s17 = smov [#allocation2]  }
   0x4   :  { %s31_s16 = sshll.u32 %s2157_s15, 4  ;;  %s18_s18 = sshll.u32 %s2158_s17, 4  ;;  %s32_s16 = int_to_ptr.vmem [resolvable:$true] %s31_s16  ;;  %s19_s18 = int_to_ptr.vmem [resolvable:$true] %s18_s18 }
   0x5   :  { %s2057_s19 = scalar_lea.vmem %s32_s16, 128  ;;  %p2062_p1 = scmp.lt.s32.totalorder %s32_s16, %s32_s16 }
   0x6   :  { %p2058_p0 = scmp.ne.s32.totalorder %s32_s16, %s2057_s19  ;;  %p2063_p2 = scmp.lt.s32.totalorder %s2057_s19, %s2057_s19 }
   0x8   :  { %p2064_p3 = por %p2063_p2, %p2062_p1 }
   0xa   :  { %p2065_p4 = pnand %p2064_p3, %p2058_p0 }
   0xc   :  { %2068 = shalt.err (!%p2065_p4)
}
   0xd   :  { %34 = dma.hbm_to_vmem [thread:$0]  %s2404_s1, 128, %s32_s16, [#allocation6]  }
   0xe   :  { %s2077_s22 = scalar_lea.vmem %s19_s18, 256  ;;  %p2082_p6 = scmp.lt.s32.totalorder %s19_s18, %s19_s18 }
   0xf   :  { %p2078_p5 = scmp.ne.s32.totalorder %s19_s18, %s2077_s22  ;;  %p2083_p7 = scmp.lt.s32.totalorder %s2077_s22, %s2077_s22 }
  0x11   :  { %p2084_p8 = por %p2083_p7, %p2082_p6 }
  0x13   :  { %p2085_p9 = pnand %p2084_p8, %p2078_p5 }
  0x15   :  { %2088 = shalt.err (!%p2085_p9)
}
  0x16   :  { %s2159_s23 = smov 128   ;;  %s2160_s24 = smov 8  }
  0x17   :  { %24 = dma.hbm_to_vmem [thread:$0]  %s2403_s0, 256, %s19_s18, [#allocation3], %s2159_s23, %s2159_s23, %s2160_s24  }
  0x18   :  { %s2161_s27 = smov [#allocation7]   ;;  %s2162_s29 = smov [#allocation8]  }
  0x19   :  { %s40_s28 = sshll.u32 %s2161_s27, 4  ;;  %s52_s1 = sshll.u32 %s2162_s29, 4  ;;  %s41_s28 = int_to_ptr.vmem [resolvable:$true] %s40_s28  ;;  %s53_s1 = int_to_ptr.vmem [resolvable:$true] %s52_s1 }
  0x1a   :  { %s2097_s30 = scalar_lea.vmem %s41_s28, 512  ;;  %p2102_p11 = scmp.lt.s32.totalorder %s41_s28, %s41_s28 }
  0x1b   :  { %p2098_p10 = scmp.ne.s32.totalorder %s41_s28, %s2097_s30  ;;  %p2103_p12 = scmp.lt.s32.totalorder %s2097_s30, %s2097_s30 }
  0x1d   :  { %p2104_p13 = por %p2103_p12, %p2102_p11 }
  0x1f   :  { %p2105_p0 = pnand %p2104_p13, %p2098_p10 }
  0x21   :  { %2108 = shalt.err (!%p2105_p0)
}
  0x22   :  { %46 = dma.hbm_to_vmem [thread:$0]  %s2405_s2, 512, %s41_s28, [#allocation6], %s2159_s23, %s2159_s23, %s2160_s24  }
  0x23   :  { %s2117_s0 = scalar_lea.vmem %s53_s1, 1024  ;;  %p2122_p2 = scmp.lt.s32.totalorder %s53_s1, %s53_s1 }
  0x24   :  { %p2118_p1 = scmp.ne.s32.totalorder %s53_s1, %s2117_s0  ;;  %p2123_p3 = scmp.lt.s32.totalorder %s2117_s0, %s2117_s0 }
  0x26   :  { %p2124_p4 = por %p2123_p3, %p2122_p2 }
  0x28   :  { %p2125_p5 = pnand %p2124_p4, %p2118_p1 }
  0x2a   :  { %2128 = shalt.err (!%p2125_p5)
}
  0x2b   :  { %58 = dma.hbm_to_vmem [thread:$0]  %s2406_s3, 1024, %s53_s1, [#allocation9], %s2159_s23, %s2159_s23, %s2160_s24  }
  0x2c   :  { %2149 = dma.done.wait [#allocation3], 256  }
  0x2d   :  { %2150 = vsyncadd [#allocation3], 4294967040 }
  0x2e   :  { %2151 = dma.done.wait [#allocation6], 640  }
  0x2f   :  { %2152 = vsyncadd [#allocation6], 4294966656 }
  0x30   :  { %2153 = dma.done.wait [#allocation9], 1024  }
  0x31   :  { %2154 = vsyncadd [#allocation9], 4294966272  ;;  %vm74_vm0 = vcmask 261120   ;;  %v71_v0 = vld [vmem:[#allocation2] sm:$0xff]  ;;  %v72_v1 = vld [vmem:[#allocation2 + $0x8] sm:$0xff]  ;;  %v102_v23 = vlaneseq  ;;  %v2163_v39 = vmov 0.0  }
  0x32   :  { %v75_v2 = vsel %vm74_vm0, %v71_v0, 0.0  ;;  %v78_v3 = vsel %vm74_vm0, %v72_v1, 0.0  ;;  %v117_v14 = vld [vmem:[#allocation7 + $0x18] sm:$0xff]  ;;  %v116_v15 = vld [vmem:[#allocation7 + $0x10] sm:$0xff]  ;;  %v115_v16 = vld [vmem:[#allocation7 + $0x8] sm:$0xff]  ;;  %1885 = vmatprep.subr.mxu1 %v2163_v39  ;;  %vm2164_vm1 = vmmov 0  }
  0x33   :  { %76 = vadd.xlane.f32.xlu0 %v75_v2  ;;  %1874 = vmatprep.subr.mxu0 %v117_v14  ;;  %v114_v17 = vld [vmem:[#allocation7] sm:$0xff]  ;;  %v2229_v25 = vshrl.u32 %v102_v23, 7  ;;  %v2232_v27 = vld [vmem:[#allocation5] sm:$0x3f]  ;;  %s2165_s2 = smov 96   ;;  %vm202_vm2 = vcmask 64512  }
  0x34   :  { %1875 = vmatpush3.msra.mxu0 %v117_v14  ;;  %1887 = vmatprep.mubr.msk.f32.mxu1 %vm2164_vm1, %v2163_v39  ;;  %s2166_s3 = smov 64   ;;  %s2167_s9 = smov 88   ;;  %vm1547_vm3 = vcmask 195584   ;;  %vm1544_vm4 = vcmask 130048  }
  0x35   :  { %1876 = vmatprep.subr.mxu0 %v116_v15  ;;  %v104_v26 = vsub.s32 0, %v2229_v25  ;;  %v110_v28 = vsub.s32 1, %v2229_v25  ;;  %s2168_s10 = smov 120   ;;  %s2169_s11 = smov 56  }
  0x36   :  { %1877 = vmatpush3.msra.mxu0 %v116_v15  ;;  %s2170_s12 = smov 80   ;;  %s2171_s13 = smov 112  }
  0x37   :  { %79 = vadd.xlane.f32.xlu0 %v78_v3  ;;  %1878 = vmatprep.subr.mxu0 %v115_v16  ;;  %v105_v29 = vrot.slane %v2232_v27, %v104_v26  ;;  %v111_v32 = vrot.slane %v2232_v27, %v110_v28  ;;  %s2172_s14 = smov 48   ;;  %s2173_s15 = smov 72  }
  0x38   :  { %1879 = vmatpush3.msra.mxu0 %v115_v16  ;;  %s2174_s16 = smov 104   ;;  %s2175_s17 = smov 40  }
  0x39   :  { %1880 = vmatprep.subr.mxu0 %v114_v17  ;;  %s2176_s18 = smov 16   ;;  %s2177_s19 = smov 24  }
  0x3a   :  { %1881 = vmatpush3.msra.mxu0 %v114_v17  ;;  %s2178_s20 = smov [#allocation10]  }
  0x3b   :  { %1895 = vmatprep.subr.mxu0 %v2163_v39  ;;  %s1780_s21 = sshll.u32 %s2178_s20, 4  ;;  %s1781_s21 = int_to_ptr.vmem [resolvable:$true] %s1780_s21 }
  0x3c   :  { %s2129_s22 = scalar_lea.vmem %s1781_s21, 256  ;;  %p2134_p7 = scmp.lt.s32.totalorder %s1781_s21, %s1781_s21 }
  0x3d   :  { %p2130_p6 = scmp.ne.s32.totalorder %s1781_s21, %s2129_s22  ;;  %p2135_p8 = scmp.lt.s32.totalorder %s2129_s22, %s2129_s22 }
  0x3f   :  { %p2136_p9 = por %p2135_p8, %p2134_p7 }
  0x41   :  { %p2137_p10 = pnand %p2136_p9, %p2130_p6 }
  0xbc   :  { %v77_v4 = vpop.xlane.xlu0 %76 }
  0xbd   :  { %v82_v5 = vmul.f32 0.03125, %v77_v4 }
  0xbf   :  { %v84_v6 = vsub.f32 %v71_v0, %v82_v5 }
  0xc0   :  { %v80_v7 = vpop.xlane.xlu0 %79 }
  0xc1   :  { %v83_v8 = vmul.f32 0.03125, %v80_v7  ;;  %v86_v9 = vmul.f32 %v84_v6, %v84_v6 }
  0xc3   :  { %v85_v10 = vsub.f32 %v72_v1, %v83_v8  ;;  %v88_v11 = vsel %vm74_vm0, %v86_v9, 0.0 }
  0xc4   :  { %89 = vadd.xlane.f32.xlu1 %v88_v11 }
  0xc5   :  { %v87_v12 = vmul.f32 %v85_v10, %v85_v10 }
  0xc7   :  { %v91_v13 = vsel %vm74_vm0, %v87_v12, 0.0 }
  0xc8   :  { %92 = vadd.xlane.f32.xlu1 %v91_v13 }
 0x14d   :  { %v90_v18 = vpop.xlane.xlu1 %89 }
 0x14e   :  { %v94_v19 = vmul.f32 0.03125, %v90_v18 }
 0x150   :  { %v96_v20 = vadd.f32 1e-05, %v94_v19 }
 0x151   :  { %v93_v21 = vpop.xlane.xlu1 %92 }
 0x152   :  { %2009 = vrsqrt.f32 %v96_v20  ;;  %v95_v22 = vmul.f32 0.03125, %v93_v21 }
 0x154   :  { %v97_v24 = vadd.f32 1e-05, %v95_v22 }
 0x156   :  { %2011 = vrsqrt.f32 %v97_v24 }
 0x15f   :  { %v2010_v30 = vpop.eup %2009 }
 0x160   :  { %v100_v31 = vmul.f32 %v2010_v30, %v84_v6 }
 0x162   :  { %v106_v33 = vmul.f32 %v105_v29, %v100_v31 }
 0x163   :  { %v2012_v34 = vpop.eup %2011 }
 0x164   :  { %v101_v35 = vmul.f32 %v2012_v34, %v85_v10  ;;  %v2237_v36 = vadd.f32 %v111_v32, %v106_v33 }
 0x166   :  { %v107_v37 = vmul.f32 %v105_v29, %v101_v35  ;;  %1882 = vmatprep.mubr.msk.f32.mxu0 %vm74_vm0, %v2237_v36 }
 0x168   :  { %v2241_v38 = vadd.f32 %v111_v32, %v107_v37 }
 0x16a   :  { %1883 = vmatmul.mubr.msk.f32.vlgmr.msra.gmra.mxu0 %vm74_vm0, %v2241_v38 }
 0x16b   :  { %1897 = vmatprep.mubr.msk.f32.mxu0 %vm2164_vm1, %v2163_v39 }
 0x22a   :  { %v2251_v40 = vpop.f32.mrf.mxu0 }
 0x22b   :  { %278 = vrot.lane.b32.xlu1 %v2251_v40, %s2165_s2 }
 0x22c   :  { %v2254_v41 = vpop.f32.mrf.mxu0 }
 0x22d   :  { %200 = vrot.lane.b32.xlu0 %v2254_v41, %s2165_s2 }
 0x29d   :  { %v279_v43 = vpop.permute.xlu1 %278 }
 0x29f   :  { %v201_v42 = vpop.permute.xlu0 %200 }
 0x2a0   :  { %1886 = vmatpush3.xpose.msk.msra.mxu1 %vm202_vm2, %v201_v42 }
 0x2a1   :  { %1890 = vmatprep.subr.mxu1 %v2163_v39 }
 0x2a3   :  { %1888 = vmatmul.mubr.msk.f32.vlgmr.msra.gmra.mxu1 %vm202_vm2, %v2254_v41 }
 0x2a4   :  { %1891 = vmatpush3.xpose.msk.msra.mxu1 %vm202_vm2, %v279_v43  ;;  %1892 = vmatprep.mubr.msk.f32.mxu1 %vm2164_vm1, %v2163_v39 }
 0x2a5   :  { %1900 = vmatprep.subr.mxu1 %v2163_v39 }
 0x2a7   :  { %1893 = vmatmul.mubr.msk.f32.vlgmr.msra.gmra.mxu1 %vm202_vm2, %v2251_v40 }
 0x2a8   :  { %1902 = vmatprep.mubr.msk.f32.mxu1 %vm2164_vm1, %v2163_v39 }
 0x363   :  { %v273_v44 = vpop.f32.mrf.mxu1 }
 0x364   :  { %v354_v45 = vsel %vm202_vm2, %v273_v44, -inf }
 0x365   :  { %355 = vmax.xlane.f32.xlu1 %v354_v45  ;;  %v1889_v46 = vpop.f32.mrf.mxu1 }
 0x367   :  { %v350_v47 = vpop.f32.mrf.mxu1 }
 0x368   :  { %v357_v48 = vsel %vm202_vm2, %v350_v47, -inf }
 0x369   :  { %358 = vmax.xlane.f32.xlu0 %v357_v48  ;;  %v1894_v49 = vpop.f32.mrf.mxu1 }
 0x376   :  { %452 = vrot.lane.b32.xlu1 %v2251_v40, %s2166_s3 }
 0x37a   :  { %530 = vrot.lane.b32.xlu1 %v2254_v41, %s2167_s9 }
 0x37e   :  { %608 = vrot.lane.b32.xlu1 %v2251_v40, %s2167_s9 }
 0x3ee   :  { %v356_v50 = vpop.xlane.xlu1 %355 }
 0x3ef   :  { %v360_v51 = vsub.f32 %v273_v44, %v356_v50 }
 0x3f1   :  { %v362_v52 = vmul.f32 1.442695, %v360_v51 }
 0x3f2   :  { %v453_v53 = vpop.permute.xlu1 %452  ;;  %v359_v54 = vpop.xlane.xlu0 %358 }
 0x3f3   :  { %2013 = vpow2.f32 %v362_v52  ;;  %v361_v55 = vsub.f32 %v350_v47, %v359_v54  ;;  %1901 = vmatpush3.msra.mxu1 %v453_v53 }
 0x3f4   :  { %1910 = vmatprep.subr.mxu1 %v2163_v39 }
 0x3f5   :  { %v364_v56 = vmul.f32 1.442695, %v361_v55 }
 0x3f6   :  { %v531_v61 = vpop.permute.xlu1 %530 }
 0x3f7   :  { %2015 = vpow2.f32 %v364_v56 }
 0x3fa   :  { %v609_v62 = vpop.permute.xlu1 %608 }
 0x400   :  { %v2014_v57 = vpop.eup %2013 }
 0x401   :  { %v366_v58 = vsel %vm202_vm2, %v2014_v57, 0.0 }
 0x402   :  { %367 = vadd.xlane.f32.xlu0 %v366_v58 }
 0x404   :  { %v2016_v59 = vpop.eup %2015 }
 0x405   :  { %v369_v60 = vsel %vm202_vm2, %v2016_v59, 0.0 }
 0x406   :  { %370 = vadd.xlane.f32.xlu1 %v369_v60 }
 0x417   :  { %606 = vrot.lane.b32.xlu1 %v2251_v40, %s2168_s10 }
 0x418   :  { %376 = vrot.lane.b32.xlu0 %v2254_v41, %s2166_s3 }
 0x41c   :  { %528 = vrot.lane.b32.xlu0 %v2254_v41, %s2168_s10 }
 0x48b   :  { %v368_v63 = vpop.xlane.xlu0 %367 }
 0x48c   :  { %2017 = vrcp.f32 %v368_v63 }
 0x48f   :  { %v371_v0 = vpop.xlane.xlu1 %370  ;;  %v377_v1 = vpop.permute.xlu0 %376 }
 0x490   :  { %2019 = vrcp.f32 %v371_v0  ;;  %1896 = vmatpush3.msra.mxu0 %v377_v1 }
 0x491   :  { %1905 = vmatprep.subr.mxu0 %v2163_v39 }
 0x493   :  { %v529_v6 = vpop.permute.xlu0 %528  ;;  %v607_v7 = vpop.permute.xlu1 %606 }
 0x499   :  { %v2018_v2 = vpop.eup %2017 }
 0x49a   :  { %v373_v3 = vmul.f32 %v2018_v2, %v2014_v57 }
 0x49c   :  { %1898 = vmatmul.mubr.msk.f32.vlgmr.msra.gmra.mxu0 %vm202_vm2, %v373_v3 }
 0x49d   :  { %v2020_v4 = vpop.eup %2019  ;;  %1906 = vmatpush3.xpose.msk.msra.mxu0 %vm202_vm2, %v531_v61  ;;  %1907 = vmatprep.mubr.msk.f32.mxu0 %vm2164_vm1, %v2163_v39 }
 0x49e   :  { %v375_v5 = vmul.f32 %v2020_v4, %v2016_v59  ;;  %1915 = vmatprep.subr.mxu0 %v2163_v39 }
 0x4a0   :  { %1903 = vmatmul.mubr.msk.f32.vlgmr.msra.gmra.mxu1 %vm202_vm2, %v375_v5  ;;  %1908 = vmatmul.mubr.msk.f32.vlgmr.msra.gmra.mxu0 %vm202_vm2, %v529_v6 }
 0x4a1   :  { %1911 = vmatpush3.xpose.msk.msra.mxu1 %vm202_vm2, %v609_v62  ;;  %1912 = vmatprep.mubr.msk.f32.mxu1 %vm2164_vm1, %v2163_v39 }
 0x4a2   :  { %1920 = vmatprep.subr.mxu1 %v2163_v39  ;;  %1917 = vmatprep.mubr.msk.f32.mxu0 %vm2164_vm1, %v2163_v39 }
 0x4a4   :  { %1913 = vmatmul.mubr.msk.f32.vlgmr.msra.gmra.mxu1 %vm202_vm2, %v607_v7 }
 0x4a5   :  { %1922 = vmatprep.mubr.msk.f32.mxu1 %vm2164_vm1, %v2163_v39 }
 0x55c   :  { %v2297_v8 = vpop.f32.mrf.mxu0 }
 0x55e   :  { %v1899_v9 = vpop.f32.mrf.mxu0 }
 0x560   :  { %v2299_v10 = vpop.f32.mrf.mxu1  ;;  %v602_v11 = vpop.f32.mrf.mxu0 }
 0x561   :  { %v684_v12 = vsel %vm202_vm2, %v602_v11, -inf }
 0x562   :  { %685 = vmax.xlane.f32.xlu0 %v684_v12  ;;  %v1904_v13 = vpop.f32.mrf.mxu1  ;;  %v1909_v14 = vpop.f32.mrf.mxu0 }
 0x564   :  { %v680_v15 = vpop.f32.mrf.mxu1 }
 0x565   :  { %v687_v16 = vsel %vm202_vm2, %v680_v15, -inf }
 0x566   :  { %688 = vmax.xlane.f32.xlu1 %v687_v16  ;;  %v1914_v17 = vpop.f32.mrf.mxu1 }
 0x577   :  { %782 = vrot.lane.b32.xlu1 %v2251_v40, %s2169_s11 }
 0x578   :  { %706 = vrot.lane.b32.xlu0 %v2254_v41, %s2169_s11 }
 0x57b   :  { %860 = vrot.lane.b32.xlu1 %v2254_v41, %s2170_s12 }
 0x57f   :  { %938 = vrot.lane.b32.xlu1 %v2251_v40, %s2170_s12 }
 0x583   :  { %936 = vrot.lane.b32.xlu1 %v2251_v40, %s2171_s13 }
 0x5eb   :  { %v686_v18 = vpop.xlane.xlu0 %685 }
 0x5ec   :  { %v690_v19 = vsub.f32 %v602_v11, %v686_v18 }
 0x5ee   :  { %v692_v20 = vmul.f32 1.442695, %v690_v19 }
 0x5ef   :  { %v707_v21 = vpop.permute.xlu0 %706  ;;  %v689_v22 = vpop.xlane.xlu1 %688 }
 0x5f0   :  { %2021 = vpow2.f32 %v692_v20  ;;  %v691_v23 = vsub.f32 %v680_v15, %v689_v22  ;;  %1916 = vmatpush3.msra.mxu0 %v707_v21 }
 0x5f1   :  { %1925 = vmatprep.subr.mxu0 %v2163_v39 }
 0x5f2   :  { %v694_v24 = vmul.f32 1.442695, %v691_v23 }
 0x5f3   :  { %v783_v26 = vpop.permute.xlu1 %782 }
 0x5f4   :  { %2023 = vpow2.f32 %v694_v24  ;;  %1921 = vmatpush3.msra.mxu1 %v783_v26 }
 0x5f5   :  { %1930 = vmatprep.subr.mxu1 %v2163_v39 }
 0x5f7   :  { %v861_v34 = vpop.permute.xlu1 %860 }
 0x5fb   :  { %v939_v43 = vpop.permute.xlu1 %938 }
 0x5fd   :  { %v2022_v28 = vpop.eup %2021 }
 0x5fe   :  { %v696_v29 = vsel %vm202_vm2, %v2022_v28, 0.0 }
 0x5ff   :  { %697 = vadd.xlane.f32.xlu0 %v696_v29  ;;  %v937_v46 = vpop.permute.xlu1 %936 }
 0x601   :  { %v2024_v30 = vpop.eup %2023 }
 0x602   :  { %v699_v31 = vsel %vm202_vm2, %v2024_v30, 0.0 }
 0x603   :  { %700 = vadd.xlane.f32.xlu0 %v699_v31 }
 0x619   :  { %858 = vrot.lane.b32.xlu0 %v2254_v41, %s2171_s13 }
 0x688   :  { %v698_v32 = vpop.xlane.xlu0 %697 }
 0x689   :  { %2025 = vrcp.f32 %v698_v32 }
 0x68c   :  { %v701_v33 = vpop.xlane.xlu0 %700 }
 0x68d   :  { %2027 = vrcp.f32 %v701_v33 }
 0x690   :  { %v859_v45 = vpop.permute.xlu0 %858 }
 0x696   :  { %v2026_v35 = vpop.eup %2025 }
 0x697   :  { %v703_v37 = vmul.f32 %v2026_v35, %v2022_v28 }
 0x699   :  { %1918 = vmatmul.mubr.msk.f32.vlgmr.msra.gmra.mxu0 %vm202_vm2, %v703_v37 }
 0x69a   :  { %v2028_v42 = vpop.eup %2027  ;;  %1926 = vmatpush3.xpose.msk.msra.mxu0 %vm202_vm2, %v861_v34  ;;  %1927 = vmatprep.mubr.msk.f32.mxu0 %vm2164_vm1, %v2163_v39 }
 0x69b   :  { %v705_v44 = vmul.f32 %v2028_v42, %v2024_v30  ;;  %1935 = vmatprep.subr.mxu0 %v2163_v39 }
 0x69d   :  { %1923 = vmatmul.mubr.msk.f32.vlgmr.msra.gmra.mxu1 %vm202_vm2, %v705_v44  ;;  %1928 = vmatmul.mubr.msk.f32.vlgmr.msra.gmra.mxu0 %vm202_vm2, %v859_v45 }
 0x69e   :  { %1931 = vmatpush3.xpose.msk.msra.mxu1 %vm202_vm2, %v939_v43  ;;  %1932 = vmatprep.mubr.msk.f32.mxu1 %vm2164_vm1, %v2163_v39 }
 0x69f   :  { %1940 = vmatprep.subr.mxu1 %v2163_v39  ;;  %1937 = vmatprep.mubr.msk.f32.mxu0 %vm2164_vm1, %v2163_v39 }
 0x6a1   :  { %1933 = vmatmul.mubr.msk.f32.vlgmr.msra.gmra.mxu1 %vm202_vm2, %v937_v46 }
 0x6a2   :  { %1942 = vmatprep.mubr.msk.f32.mxu1 %vm2164_vm1, %v2163_v39 }
 0x759   :  { %v2329_v47 = vpop.f32.mrf.mxu0 }
 0x75b   :  { %v1919_v48 = vpop.f32.mrf.mxu0 }
 0x75d   :  { %v2331_v49 = vpop.f32.mrf.mxu1  ;;  %v932_v50 = vpop.f32.mrf.mxu0 }
 0x75e   :  { %v1014_v51 = vsel %vm202_vm2, %v932_v50, -inf }
 0x75f   :  { %1015 = vmax.xlane.f32.xlu0 %v1014_v51  ;;  %v1924_v52 = vpop.f32.mrf.mxu1  ;;  %v1929_v53 = vpop.f32.mrf.mxu0 }
 0x761   :  { %v1010_v54 = vpop.f32.mrf.mxu1 }
 0x762   :  { %v1017_v55 = vsel %vm202_vm2, %v1010_v54, -inf }
 0x763   :  { %1018 = vmax.xlane.f32.xlu1 %v1017_v55  ;;  %v1934_v56 = vpop.f32.mrf.mxu1 }
 0x774   :  { %1112 = vrot.lane.b32.xlu1 %v2251_v40, %s2172_s14 }
 0x775   :  { %1036 = vrot.lane.b32.xlu0 %v2254_v41, %s2172_s14 }
 0x778   :  { %1190 = vrot.lane.b32.xlu1 %v2254_v41, %s2173_s15 }
 0x77c   :  { %1268 = vrot.lane.b32.xlu1 %v2251_v40, %s2173_s15 }
 0x780   :  { %1266 = vrot.lane.b32.xlu1 %v2251_v40, %s2174_s16 }
 0x7e8   :  { %v1016_v57 = vpop.xlane.xlu0 %1015 }
 0x7e9   :  { %v1020_v58 = vsub.f32 %v932_v50, %v1016_v57 }
 0x7eb   :  { %v1022_v59 = vmul.f32 1.442695, %v1020_v58 }
 0x7ec   :  { %v1037_v60 = vpop.permute.xlu0 %1036  ;;  %v1019_v61 = vpop.xlane.xlu1 %1018 }
 0x7ed   :  { %2029 = vpow2.f32 %v1022_v59  ;;  %v1021_v62 = vsub.f32 %v1010_v54, %v1019_v61  ;;  %1936 = vmatpush3.msra.mxu0 %v1037_v60 }
 0x7ee   :  { %1945 = vmatprep.subr.mxu0 %v2163_v39 }
 0x7ef   :  { %v1024_v63 = vmul.f32 1.442695, %v1021_v62 }
 0x7f0   :  { %v1113_v0 = vpop.permute.xlu1 %1112 }
 0x7f1   :  { %2031 = vpow2.f32 %v1024_v63  ;;  %1941 = vmatpush3.msra.mxu1 %v1113_v0 }
 0x7f2   :  { %1950 = vmatprep.subr.mxu1 %v2163_v39 }
 0x7f4   :  { %v1191_v7 = vpop.permute.xlu1 %1190 }
 0x7f8   :  { %v1269_v13 = vpop.permute.xlu1 %1268 }
 0x7fa   :  { %v2030_v1 = vpop.eup %2029 }
 0x7fb   :  { %v1026_v2 = vsel %vm202_vm2, %v2030_v1, 0.0 }
 0x7fc   :  { %1027 = vadd.xlane.f32.xlu0 %v1026_v2  ;;  %v1267_v16 = vpop.permute.xlu1 %1266 }
 0x7fe   :  { %v2032_v3 = vpop.eup %2031 }
 0x7ff   :  { %v1029_v4 = vsel %vm202_vm2, %v2032_v3, 0.0 }
 0x800   :  { %1030 = vadd.xlane.f32.xlu0 %v1029_v4 }
 0x816   :  { %1188 = vrot.lane.b32.xlu0 %v2254_v41, %s2174_s16 }
 0x885   :  { %v1028_v5 = vpop.xlane.xlu0 %1027 }
 0x886   :  { %2033 = vrcp.f32 %v1028_v5 }
 0x889   :  { %v1031_v6 = vpop.xlane.xlu0 %1030 }
 0x88a   :  { %2035 = vrcp.f32 %v1031_v6 }
 0x88d   :  { %v1189_v15 = vpop.permute.xlu0 %1188 }
 0x893   :  { %v2034_v9 = vpop.eup %2033 }
 0x894   :  { %v1033_v11 = vmul.f32 %v2034_v9, %v2030_v1 }
 0x896   :  { %1938 = vmatmul.mubr.msk.f32.vlgmr.msra.gmra.mxu0 %vm202_vm2, %v1033_v11 }
 0x897   :  { %v2036_v12 = vpop.eup %2035  ;;  %1946 = vmatpush3.xpose.msk.msra.mxu0 %vm202_vm2, %v1191_v7  ;;  %1947 = vmatprep.mubr.msk.f32.mxu0 %vm2164_vm1, %v2163_v39 }
 0x898   :  { %v1035_v14 = vmul.f32 %v2036_v12, %v2032_v3  ;;  %1955 = vmatprep.subr.mxu0 %v2163_v39 }
 0x89a   :  { %1943 = vmatmul.mubr.msk.f32.vlgmr.msra.gmra.mxu1 %vm202_vm2, %v1035_v14  ;;  %1948 = vmatmul.mubr.msk.f32.vlgmr.msra.gmra.mxu0 %vm202_vm2, %v1189_v15  ;;  %v1593_v14 = vld [vmem:[#allocation8 + $0x18] sm:$0xff]  ;;  %v1591_v15 = vld [vmem:[#allocation8 + $0x8] sm:$0xff] }
 0x89b   :  { %1951 = vmatpush3.xpose.msk.msra.mxu1 %vm202_vm2, %v1269_v13  ;;  %1952 = vmatprep.mubr.msk.f32.mxu1 %vm2164_vm1, %v2163_v39 }
 0x89c   :  { %1960 = vmatprep.subr.mxu1 %v2163_v39  ;;  %1957 = vmatprep.mubr.msk.f32.mxu0 %vm2164_vm1, %v2163_v39 }
 0x89e   :  { %1953 = vmatmul.mubr.msk.f32.vlgmr.msra.gmra.mxu1 %vm202_vm2, %v1267_v16  ;;  %v1590_v16 = vld [vmem:[#allocation8] sm:$0xff] }
 0x89f   :  { %1962 = vmatprep.mubr.msk.f32.mxu1 %vm2164_vm1, %v2163_v39 }
 0x956   :  { %v1108_v17 = vpop.f32.mrf.mxu0 }
 0x958   :  { %v1939_v18 = vpop.f32.mrf.mxu0 }
 0x95a   :  { %v1184_v19 = vpop.f32.mrf.mxu1  ;;  %v1262_v20 = vpop.f32.mrf.mxu0 }
 0x95b   :  { %v1344_v21 = vsel %vm202_vm2, %v1262_v20, -inf }
 0x95c   :  { %1345 = vmax.xlane.f32.xlu0 %v1344_v21  ;;  %v1944_v22 = vpop.f32.mrf.mxu1  ;;  %v1949_v23 = vpop.f32.mrf.mxu0 }
 0x95d   :  { %v1580_v23 = vsub.s32 2, %v2229_v25 }
 0x95e   :  { %v1340_v24 = vpop.f32.mrf.mxu1 }
 0x95f   :  { %v1347_v26 = vsel %vm202_vm2, %v1340_v24, -inf }
 0x960   :  { %1348 = vmax.xlane.f32.xlu1 %v1347_v26  ;;  %v1954_v28 = vpop.f32.mrf.mxu1  ;;  %v1581_v26 = vrot.slane %v2232_v27, %v1580_v23 }
 0x971   :  { %1442 = vrot.lane.b32.xlu1 %v2251_v40, %s2175_s17 }
 0x975   :  { %1520 = vrot.lane.b32.xlu1 %v2329_v47, %s2160_s24 }
 0x979   :  { %1522 = vrot.lane.b32.xlu1 %v2331_v49, %s2160_s24 }
 0x97d   :  { %1530 = vrot.lane.b32.xlu1 %v1184_v19, %s2176_s18 }
 0x9e5   :  { %v1346_v39 = vpop.xlane.xlu0 %1345 }
 0x9e6   :  { %v1350_v29 = vsub.f32 %v1262_v20, %v1346_v39 }
 0x9e8   :  { %v1352_v30 = vmul.f32 1.442695, %v1350_v29 }
 0x9e9   :  { %v1349_v31 = vpop.xlane.xlu1 %1348 }
 0x9ea   :  { %2037 = vpow2.f32 %v1352_v30  ;;  %v1351_v32 = vsub.f32 %v1340_v24, %v1349_v31  ;;  %v1586_v24 = vsub.s32 3, %v2229_v25 }
 0x9ec   :  { %v1354_v33 = vmul.f32 1.442695, %v1351_v32  ;;  %v1587_v29 = vrot.slane %v2232_v27, %v1586_v24 }
 0x9ed   :  { %v1443_v34 = vpop.permute.xlu1 %1442 }
 0x9ee   :  { %2039 = vpow2.f32 %v1354_v33  ;;  %1961 = vmatpush3.msra.mxu1 %v1443_v34 }
 0x9f1   :  { %v1521_v53 = vpop.permute.xlu1 %1520 }
 0x9f2   :  { %v1542_v56 = vsel %vm202_vm2, %v2297_v8, %v1521_v53 }
 0x9f5   :  { %v1523_v54 = vpop.permute.xlu1 %1522 }
 0x9f6   :  { %v1543_v62 = vsel %vm202_vm2, %v2299_v10, %v1523_v54 }
 0x9f7   :  { %v2038_v35 = vpop.eup %2037 }
 0x9f8   :  { %v1356_v40 = vsel %vm202_vm2, %v2038_v35, 0.0 }
 0x9f9   :  { %1357 = vadd.xlane.f32.xlu0 %v1356_v40  ;;  %v1531_v57 = vpop.permute.xlu1 %1530  ;;  %v1685_v40 = vld [vmem:[#allocation8 + $0x38] sm:$0xff] }
 0x9fa   :  { %v1546_v63 = vsel %vm1544_vm4, %v1543_v62, %v1531_v57  ;;  %1976 = vmatprep.subr.mxu1 %v1685_v40 }
 0x9fb   :  { %v2040_v37 = vpop.eup %2039 }
 0x9fc   :  { %v1359_v42 = vsel %vm202_vm2, %v2040_v37, 0.0 }
 0x9fd   :  { %1360 = vadd.xlane.f32.xlu0 %v1359_v42  ;;  %v1683_v42 = vld [vmem:[#allocation8 + $0x28] sm:$0xff] }
 0xa13   :  { %1366 = vrot.lane.b32.xlu0 %v2254_v41, %s2175_s17 }
 0xa17   :  { %1528 = vrot.lane.b32.xlu0 %v1108_v17, %s2176_s18 }
 0xa82   :  { %v1358_v43 = vpop.xlane.xlu0 %1357 }
 0xa83   :  { %2041 = vrcp.f32 %v1358_v43  ;;  %v1682_v43 = vld [vmem:[#allocation8 + $0x20] sm:$0xff] }
 0xa86   :  { %v1361_v44 = vpop.xlane.xlu0 %1360 }
 0xa87   :  { %2043 = vrcp.f32 %v1361_v44  ;;  %v1596_v44 = vsub.s32 4, %v2229_v25 }
 0xa8a   :  { %v1367_v45 = vpop.permute.xlu0 %1366 }
 0xa8b   :  { %1956 = vmatpush3.msra.mxu0 %v1367_v45  ;;  %v1597_v45 = vrot.slane %v2232_v27, %v1596_v44 }
 0xa8c   :  { %1965 = vmatprep.subr.mxu0 %v1593_v14 }
 0xa8e   :  { %v1529_v55 = vpop.permute.xlu0 %1528 }
 0xa8f   :  { %v1545_v58 = vsel %vm1544_vm4, %v1542_v56, %v1529_v55 }
 0xa90   :  { %v2042_v46 = vpop.eup %2041 }
 0xa91   :  { %v1363_v47 = vmul.f32 %v2042_v46, %v2038_v35 }
 0xa93   :  { %1958 = vmatmul.mubr.msk.f32.vlgmr.msra.gmra.mxu0 %vm202_vm2, %v1363_v47 }
 0xa94   :  { %v2044_v48 = vpop.eup %2043  ;;  %1966 = vmatpush3.msra.mxu0 %v1593_v14 }
 0xa95   :  { %v1365_v49 = vmul.f32 %v2044_v48, %v2040_v37  ;;  %v1684_v37 = vld [vmem:[#allocation8 + $0x30] sm:$0xff] }
 0xa97   :  { %1963 = vmatmul.mubr.msk.f32.vlgmr.msra.gmra.mxu1 %vm202_vm2, %v1365_v49 }
 0xa98   :  { %1977 = vmatpush3.msra.mxu1 %v1685_v40 }
 0xa99   :  { %1978 = vmatprep.subr.mxu1 %v1684_v37 }
 0xa9a   :  { %1979 = vmatpush3.msra.mxu1 %v1684_v37 }
 0xa9b   :  { %1980 = vmatprep.subr.mxu1 %v1683_v42 }
 0xa9c   :  { %1981 = vmatpush3.msra.mxu1 %v1683_v42 }
 0xa9d   :  { %1982 = vmatprep.subr.mxu1 %v1682_v43 }
 0xa9e   :  { %1983 = vmatpush3.msra.mxu1 %v1682_v43 }
 0xb53   :  { %v1438_v50 = vpop.f32.mrf.mxu0 }
 0xb54   :  { %1536 = vrot.lane.b32.xlu0 %v1438_v50, %s2177_s19 }
 0xb55   :  { %v1959_v51 = vpop.f32.mrf.mxu0 }
 0xb57   :  { %v1514_v41 = vpop.f32.mrf.mxu1 }
 0xb58   :  { %1538 = vrot.lane.b32.xlu1 %v1514_v41, %s2177_s19  ;;  %v1688_v41 = vsub.s32 5, %v2229_v25 }
 0xb59   :  { %v1964_v52 = vpop.f32.mrf.mxu1 }
 0xb5a   :  { %v1689_v52 = vrot.slane %v2232_v27, %v1688_v41 }
 0xbc6   :  { %v1537_v59 = vpop.permute.xlu0 %1536 }
 0xbc7   :  { %v1548_v60 = vsel %vm1547_vm3, %v1545_v58, %v1537_v59 }
 0xbc8   :  { %v1550_v61 = vadd.f32 %v1548_v60, %v2237_v36 }
 0xbca   :  { %v1539_v0 = vpop.permute.xlu1 %1538  ;;  %v1552_v1 = vsel %vm74_vm0, %v1550_v61, 0.0 }
 0xbcb   :  { %v1549_v2 = vsel %vm1547_vm3, %v1546_v63, %v1539_v0  ;;  %1553 = vadd.xlane.f32.xlu0 %v1552_v1 }
 0xbcc   :  { %v1551_v3 = vadd.f32 %v1549_v2, %v2241_v38  ;;  %v1592_v38 = vld [vmem:[#allocation8 + $0x10] sm:$0xff] }
 0xbcd   :  { %1967 = vmatprep.subr.mxu0 %v1592_v38 }
 0xbce   :  { %v1555_v8 = vsel %vm74_vm0, %v1551_v3, 0.0  ;;  %1968 = vmatpush3.msra.mxu0 %v1592_v38 }
 0xbcf   :  { %1556 = vadd.xlane.f32.xlu1 %v1555_v8  ;;  %1969 = vmatprep.subr.mxu0 %v1591_v15 }
 0xbd0   :  { %1970 = vmatpush3.msra.mxu0 %v1591_v15 }
 0xbd1   :  { %1971 = vmatprep.subr.mxu0 %v1590_v16 }
 0xbd2   :  { %1972 = vmatpush3.msra.mxu0 %v1590_v16 }
 0xc54   :  { %v1554_v4 = vpop.xlane.xlu0 %1553 }
 0xc55   :  { %v1558_v5 = vmul.f32 0.03125, %v1554_v4 }
 0xc57   :  { %v1560_v6 = vsub.f32 %v1550_v61, %v1558_v5 }
 0xc58   :  { %v1557_v7 = vpop.xlane.xlu1 %1556 }
 0xc59   :  { %v1559_v9 = vmul.f32 0.03125, %v1557_v7  ;;  %v1562_v36 = vmul.f32 %v1560_v6, %v1560_v6 }
 0xc5b   :  { %v1561_v11 = vsub.f32 %v1551_v3, %v1559_v9  ;;  %v1564_v10 = vsel %vm74_vm0, %v1562_v36, 0.0 }
 0xc5c   :  { %1565 = vadd.xlane.f32.xlu0 %v1564_v10 }
 0xc5d   :  { %v1563_v12 = vmul.f32 %v1561_v11, %v1561_v11 }
 0xc5f   :  { %v1567_v13 = vsel %vm74_vm0, %v1563_v12, 0.0 }
 0xc60   :  { %1568 = vadd.xlane.f32.xlu0 %v1567_v13 }
 0xce5   :  { %v1566_v17 = vpop.xlane.xlu0 %1565 }
 0xce6   :  { %v1570_v18 = vmul.f32 0.03125, %v1566_v17 }
 0xce8   :  { %v1572_v19 = vadd.f32 1e-05, %v1570_v18 }
 0xce9   :  { %v1569_v20 = vpop.xlane.xlu0 %1568 }
 0xcea   :  { %2045 = vrsqrt.f32 %v1572_v19  ;;  %v1571_v21 = vmul.f32 0.03125, %v1569_v20 }
 0xcec   :  { %v1573_v22 = vadd.f32 1e-05, %v1571_v21 }
 0xcee   :  { %2047 = vrsqrt.f32 %v1573_v22 }
 0xcf7   :  { %v2046_v28 = vpop.eup %2045 }
 0xcf8   :  { %v1576_v39 = vmul.f32 %v2046_v28, %v1560_v6 }
 0xcfa   :  { %v1582_v30 = vmul.f32 %v1581_v26, %v1576_v39 }
 0xcfb   :  { %v2048_v31 = vpop.eup %2047 }
 0xcfc   :  { %v1577_v32 = vmul.f32 %v2048_v31, %v1561_v11  ;;  %v1588_v33 = vadd.f32 %v1587_v29, %v1582_v30 }
 0xcfe   :  { %v1583_v34 = vmul.f32 %v1581_v26, %v1577_v32  ;;  %1973 = vmatprep.mubr.msk.f32.mxu0 %vm74_vm0, %v1588_v33 }
 0xd00   :  { %v1589_v35 = vadd.f32 %v1587_v29, %v1583_v34 }
 0xd02   :  { %1974 = vmatmul.mubr.msk.f32.vlgmr.msra.gmra.mxu0 %vm74_vm0, %v1589_v35 }
 0xdc2   :  { %v1975_v46 = vpop.f32.mrf.mxu0 }
 0xdc3   :  { %v1676_v47 = vadd.f32 %v1975_v46, %v1597_v45 }
 0xdc4   :  { %v1670_v48 = vpop.f32.mrf.mxu0 }
 0xdc5   :  { %v1671_v49 = vadd.f32 %v1670_v48, %v1597_v45  ;;  %v1680_v51 = vmax.f32 %v1676_v47, 0.0 }
 0xdc7   :  { %v1679_v50 = vmax.f32 %v1671_v49, 0.0 }
 0xdc9   :  { %1984 = vmatprep.mubr.msk.f32.mxu1 %vm74_vm0, %v1679_v50 }
 0xdca   :  { %1985 = vmatmul.mubr.msk.f32.vlgmr.msra.gmra.mxu1 %vm74_vm0, %v1680_v51 }
 0xe8a   :  { %v1986_v53 = vpop.f32.mrf.mxu1 }
 0xe8b   :  { %v1768_v54 = vadd.f32 %v1986_v53, %v1689_v52 }
 0xe8c   :  { %v1762_v55 = vpop.f32.mrf.mxu1 }
 0xe8d   :  { %v1772_v56 = vadd.f32 %v1768_v54, %v1589_v35  ;;  %v1763_v57 = vadd.f32 %v1762_v55, %v1689_v52 }
 0xe8f   :  { %1774 = vst.msk [vmem:[#allocation10 + $0x8] sm:$0xff] %vm74_vm0, %v1772_v56  ;;  %v1771_v58 = vadd.f32 %v1763_v57, %v1588_v33 }
 0xe91   :  { %1773 = vst.msk [vmem:[#allocation10] sm:$0xff] %vm74_vm0, %v1771_v58 }
 0xe92   :  { %2140 = shalt.err (!%p2137_p10)
}
 0xe93   :  { %1786 = dma.vmem_to_hbm [thread:$0]  %s1781_s21, 256, %s2407_s4, [#allocation4], %s2159_s23, %s2159_s23, %s2160_s24  }
 0xe94   :  { %2155 = dma.done.wait [#allocation4], 256  }
 0xe95   :  { %2156 = vsyncadd [#allocation4], 4294967040 }
 0xe96   :  { %1790 = vsyncpa [#allocation3], 1 }
 0xe97   :  { %1791 = vsyncpa [#allocation6], 1 }
 0xe98   :  { %1792 = vsyncpa [#allocation9], 1 }
 0xe99   :  { %1793 = vsyncpa [#allocation4], 1 }

</bundles_post_ra>
